<compile_context>
chip_gen: v7x
topology: tpu7x:2x2x1
jax: 0.10.0
libtpu: 0.0.40
codegen_flags: <defaults>
</compile_context>

<pallas_src>
import functools

import jax
import jax.numpy as jnp
from jax.experimental import pallas as pl
from jax.experimental.pallas import tpu as pltpu


# ---------------------------------------------------------------------------
# Fused whole-stack kernel: grid = (batch_tile, layer); one step == one layer
# of one batch tile.  The activation stays resident in out_ref across layers.
# ---------------------------------------------------------------------------
def decoder_stack_kernel(
    x0_ref, mask_ref,
    n1a_ref, n1b_ref, wqkv_ref, bqkv_ref, wo_ref, bo_ref,
    n2a_ref, n2b_ref, w1_ref, b1_ref, w2_ref, b2_ref,
    fna_ref, fnb_ref,
    out_ref,
    *, S, D, H, eps,
):
    l = pl.program_id(1)
    dk = D // H
    scale = 1.0 / float(dk) ** 0.5
    bf16 = jnp.bfloat16

    # Initialize the resident activation from x0 on the first layer of this tile.
    @pl.when(l == 0)
    def _():
        out_ref[...] = x0_ref[...]

    x = out_ref[...]                                           # (S, D) f32

    def norm(y, alpha, bias):
        # PyTorch tutorial Norm: alpha*(y-mean)/(std+eps)+bias, unbiased std.
        mean = jnp.mean(y, axis=-1, keepdims=True)
        yc = y - mean
        var = jnp.sum(yc * yc, axis=-1, keepdims=True) * (1.0 / float(D - 1))
        std = jnp.sqrt(var)
        return alpha * yc / (std + eps) + bias                 # exact divide

    # ---------------- self-attention sub-layer ----------------------------
    n1 = norm(x, n1a_ref[0], n1b_ref[0])                       # (S, D) f32
    # Fused QKV projection: bf16 operands, f32 accumulation on the MXU.
    qkv = jnp.dot(n1.astype(bf16), wqkv_ref[0],
                  preferred_element_type=jnp.float32) + bqkv_ref[0]   # (S, 3D)
    q = qkv[:, 0:D] * scale          # fold 1/sqrt(dk) into q, not (H,S,S) scores
    k = qkv[:, D:2 * D]
    v = qkv[:, 2 * D:3 * D]

    # Head-major (H, S, dk) view: cheap lane slices + major-dim stack, then ONE
    # batched einsum per matmul (no per-head matmuls, no scratch stores).
    def split_heads(t):
        return jnp.stack([t[:, h * dk:(h + 1) * dk] for h in range(H)], axis=0)

    qh = split_heads(q).astype(bf16)                           # (H, S, dk)
    kh = split_heads(k).astype(bf16)
    vh = split_heads(v).astype(bf16)

    s = jnp.einsum("hqd,hkd->hqk", qh, kh,
                   preferred_element_type=jnp.float32)         # (H, S, S)
    m = mask_ref[0]                                            # (S, S)
    s = jnp.where(m[None, :, :] == 0, -1e9, s)                 # masked_fill(mask==0)
    s = s - jnp.max(s, axis=-1, keepdims=True)
    e = jnp.exp(s)
    p = e * pl.reciprocal(jnp.sum(e, axis=-1, keepdims=True),
                          approx=True)                         # softmax(dim=-1)
    ctx = jnp.einsum("hqk,hkd->hqd", p.astype(bf16), vh,
                     preferred_element_type=jnp.float32)       # (H, S, dk)
    concat = jnp.concatenate([ctx[h] for h in range(H)], axis=-1)   # (S, D)

    attn_out = jnp.dot(concat.astype(bf16), wo_ref[0],
                       preferred_element_type=jnp.float32) + bo_ref[0]
    x = x + attn_out                                           # residual

    # ---------------- feed-forward sub-layer -------------------------------
    n2 = norm(x, n2a_ref[0], n2b_ref[0])
    hdn = jnp.dot(n2.astype(bf16), w1_ref[0],
                  preferred_element_type=jnp.float32) + b1_ref[0]
    hdn = jnp.maximum(hdn, 0.0)                                # ReLU
    ff = jnp.dot(hdn.astype(bf16), w2_ref[0],
                 preferred_element_type=jnp.float32) + b2_ref[0]
    x = x + ff                                                 # residual

    out_ref[...] = x                                           # stays resident

    # Final norm, written in place on the last layer only.
    @pl.when(l == pl.num_programs(1) - 1)
    def _():
        out_ref[...] = norm(x, fna_ref[...], fnb_ref[...])


def _vmem_limit_bytes():
    # Budget scoped VMEM from the actual chip (64 MiB on v7x) with headroom.
    try:
        cap = pltpu.get_tpu_info().vmem_capacity_bytes
        return min(int(cap * 3 // 4), 100 * 1024 * 1024)
    except Exception:
        return None


# ---------------------------------------------------------------------------
# Wrapper: one pallas_call for the whole decoder stack.
# ---------------------------------------------------------------------------
def decoder_stack_pallas(x0, trg_mask, params, heads, eps=1e-6):
    BS, D = x0.shape
    B, S, _ = trg_mask.shape
    assert BS == B * S
    assert D % heads == 0
    L = params["wqkv"].shape[0]
    d_ff = params["w1"].shape[-1]

    kernel = functools.partial(decoder_stack_kernel, S=S, D=D, H=heads, eps=eps)

    per_layer = lambda shape: pl.BlockSpec(shape, lambda b, l: (l, 0, 0))
    shared2d = lambda shape: pl.BlockSpec(shape, lambda b, l: (0, 0))

    in_specs = [
        pl.BlockSpec((S, D), lambda b, l: (b, 0)),             # x0 (per-batch tile)
        pl.BlockSpec((1, S, S), lambda b, l: (b, 0, 0)),       # mask (per-batch)
        per_layer((1, 1, D)),                                  # n1 alpha
        per_layer((1, 1, D)),                                  # n1 bias
        per_layer((1, D, 3 * D)),                              # wqkv  (bf16)
        per_layer((1, 1, 3 * D)),                              # bqkv
        per_layer((1, D, D)),                                  # wo    (bf16)
        per_layer((1, 1, D)),                                  # bo
        per_layer((1, 1, D)),                                  # n2 alpha
        per_layer((1, 1, D)),                                  # n2 bias
        per_layer((1, D, d_ff)),                               # w1    (bf16)
        per_layer((1, 1, d_ff)),                               # b1
        per_layer((1, d_ff, D)),                               # w2    (bf16)
        per_layer((1, 1, D)),                                  # b2
        shared2d((1, D)),                                      # final norm alpha
        shared2d((1, D)),                                      # final norm bias
    ]

    return pl.pallas_call(
        kernel,
        out_shape=jax.ShapeDtypeStruct((BS, D), jnp.float32),
        grid=(B, L),                                           # batch parallel, layers sequential
        in_specs=in_specs,
        # Output block depends only on b -> resident across the layer axis.
        out_specs=pl.BlockSpec((S, D), lambda b, l: (b, 0)),
        compiler_params=pltpu.CompilerParams(
            dimension_semantics=("parallel", "arbitrary"),
            vmem_limit_bytes=_vmem_limit_bytes(),
        ),
    )(
        x0, trg_mask,
        params["n1a"], params["n1b"], params["wqkv"], params["bqkv"],
        params["wo"], params["bo"],
        params["n2a"], params["n2b"], params["w1"], params["b1"],
        params["w2"], params["b2"],
        params["fna"], params["fnb"],
    )


# ---------------------------------------------------------------------------
# Module forward (embedding lookups + the single fused pallas_call)
# ---------------------------------------------------------------------------
@functools.partial(jax.jit, static_argnums=(4,))
def decoder_forward(params, feature, step, trg_mask, heads):
    B, S, D = feature.shape
    pos_emb = params["embedP"][:S]                  # position = arange(S) lookup
    step_emb = params["embed"][step] * 0.0          # embed(step) * 0 (exact semantics)
    x0 = (feature + pos_emb[None, :, :] + step_emb).reshape(B * S, D)
    out = decoder_stack_pallas(x0, trg_mask, params, heads)
    return out.reshape(B, S, D)


# ---------------------------------------------------------------------------
# Deterministic parameter init (per-layer weights stacked; matmul weights bf16)
# ---------------------------------------------------------------------------
def init_params(key, vocab_size, d_model, n_layers, d_ff, max_length):
    def nrm(k, shape, scale=0.05):
        return scale * jax.random.normal(k, shape, jnp.float32)

    bf16 = jnp.bfloat16
    keys = jax.random.split(key, 4 + n_layers)
    wqkv, bqkv, wo, bo, w1, b1, w2, b2 = ([] for _ in range(8))
    for i in range(n_layers):
        lk = jax.random.split(keys[4 + i], 8)
        wq = nrm(lk[0], (d_model, d_model))
        wk = nrm(lk[1], (d_model, d_model))
        wv = nrm(lk[2], (d_model, d_model))
        wqkv.append(jnp.concatenate([wq, wk, wv], axis=1).astype(bf16))   # (D, 3D)
        bqkv.append(jnp.zeros((1, 3 * d_model), jnp.float32))
        wo.append(nrm(lk[3], (d_model, d_model)).astype(bf16))
        bo.append(jnp.zeros((1, d_model), jnp.float32))
        w1.append(nrm(lk[4], (d_model, d_ff)).astype(bf16))
        b1.append(jnp.zeros((1, d_ff), jnp.float32))
        w2.append(nrm(lk[5], (d_ff, d_model)).astype(bf16))
        b2.append(jnp.zeros((1, d_model), jnp.float32))

    L = n_layers
    return {
        "embed":  nrm(keys[0], (vocab_size, d_model)),
        "embedP": nrm(keys[1], (max_length, d_model)),
        "wqkv": jnp.stack(wqkv), "bqkv": jnp.stack(bqkv),
        "wo": jnp.stack(wo),     "bo": jnp.stack(bo),
        "w1": jnp.stack(w1),     "b1": jnp.stack(b1),
        "w2": jnp.stack(w2),     "b2": jnp.stack(b2),
        "n1a": jnp.ones((L, 1, d_model), jnp.float32),
        "n1b": jnp.zeros((L, 1, d_model), jnp.float32),
        "n2a": jnp.ones((L, 1, d_model), jnp.float32),
        "n2b": jnp.zeros((L, 1, d_model), jnp.float32),
        "fna": jnp.ones((1, d_model), jnp.float32),
        "fnb": jnp.zeros((1, d_model), jnp.float32),
    }


# ---------------------------------------------------------------------------
if __name__ == "__main__":
    B, S = 2, 8
    vocab_size = 50
    d_model = 32
    n_layers = 2
    heads = 4
    d_ff = 64
    max_length = 1024

    key = jax.random.PRNGKey(0)
    kp, kf, ks = jax.random.split(key, 3)

    params = init_params(kp, vocab_size, d_model, n_layers, d_ff, max_length)

    feature = jax.random.normal(kf, (B, S, d_model), jnp.float32)      # (B, S, D)
    step = jax.random.randint(ks, (B, 1), 0, vocab_size, jnp.int32)    # token indices
    # causal target mask, 1 = keep, 0 = masked (broadcast over heads)
    trg_mask = jnp.broadcast_to(
        jnp.tril(jnp.ones((S, S), jnp.float32)), (B, S, S)
    )

    out = decoder_forward(params, feature, step, trg_mask, heads)
    out = jax.block_until_ready(out)
    assert out.shape == (B, S, d_model)
    assert bool(jnp.all(jnp.isfinite(out)))
    print("KERNEL_OK")
</pallas_src>

<mosaic_0001>
module attributes {stable_mosaic.version = 11 : i64} {
  func.func @decoder_stack_kernel(%arg0: i32, %arg1: i32, %arg2: memref<8x32xf32, #tpu.memory_space<vmem>>, %arg3: memref<1x8x8xf32, #tpu.memory_space<vmem>>, %arg4: memref<1x1x32xf32, #tpu.memory_space<vmem>>, %arg5: memref<1x1x32xf32, #tpu.memory_space<vmem>>, %arg6: memref<1x32x96xbf16, #tpu.memory_space<vmem>>, %arg7: memref<1x1x96xf32, #tpu.memory_space<vmem>>, %arg8: memref<1x32x32xbf16, #tpu.memory_space<vmem>>, %arg9: memref<1x1x32xf32, #tpu.memory_space<vmem>>, %arg10: memref<1x1x32xf32, #tpu.memory_space<vmem>>, %arg11: memref<1x1x32xf32, #tpu.memory_space<vmem>>, %arg12: memref<1x32x64xbf16, #tpu.memory_space<vmem>>, %arg13: memref<1x1x64xf32, #tpu.memory_space<vmem>>, %arg14: memref<1x64x32xbf16, #tpu.memory_space<vmem>>, %arg15: memref<1x1x32xf32, #tpu.memory_space<vmem>>, %arg16: memref<1x32xf32, #tpu.memory_space<vmem>>, %arg17: memref<1x32xf32, #tpu.memory_space<vmem>>, %arg18: memref<8x32xf32, #tpu.memory_space<vmem>>) attributes {dimension_semantics = [#tpu.dimension_semantics<parallel>, #tpu.dimension_semantics<arbitrary>], iteration_bounds = array<i64: 2, 2>, scalar_prefetch = 0 : i64, scratch_operands = 0 : i64, tpu.core_type = #tpu.core_type<tc>, window_params = [{transform_indices = @transform_0, window_bounds = array<i64: 8, 32>}, {transform_indices = @transform_1, window_bounds = array<i64: 1, 8, 8>}, {transform_indices = @transform_2, window_bounds = array<i64: 1, 1, 32>}, {transform_indices = @transform_3, window_bounds = array<i64: 1, 1, 32>}, {transform_indices = @transform_4, window_bounds = array<i64: 1, 32, 96>}, {transform_indices = @transform_5, window_bounds = array<i64: 1, 1, 96>}, {transform_indices = @transform_6, window_bounds = array<i64: 1, 32, 32>}, {transform_indices = @transform_7, window_bounds = array<i64: 1, 1, 32>}, {transform_indices = @transform_8, window_bounds = array<i64: 1, 1, 32>}, {transform_indices = @transform_9, window_bounds = array<i64: 1, 1, 32>}, {transform_indices = @transform_10, window_bounds = array<i64: 1, 32, 64>}, {transform_indices = @transform_11, window_bounds = array<i64: 1, 1, 64>}, {transform_indices = @transform_12, window_bounds = array<i64: 1, 64, 32>}, {transform_indices = @transform_13, window_bounds = array<i64: 1, 1, 32>}, {pipeline_mode = #tpu.pipeline_mode<synchronous>, transform_indices = @transform_14, window_bounds = array<i64: 1, 32>}, {pipeline_mode = #tpu.pipeline_mode<synchronous>, transform_indices = @transform_15, window_bounds = array<i64: 1, 32>}, {transform_indices = @transform_16, window_bounds = array<i64: 8, 32>}]} {
    %c0_i32 = arith.constant 0 : i32
    %0 = arith.cmpi eq, %arg1, %c0_i32 : i32
    %1 = arith.extui %0 : i1 to i32
    %c0_i32_0 = arith.constant 0 : i32
    %2 = arith.cmpi ne, %1, %c0_i32_0 : i32
    scf.if %2 {
      %c0_65 = arith.constant 0 : index
      %c0_66 = arith.constant 0 : index
      %158 = vector.load %arg2[%c0_65, %c0_66] : memref<8x32xf32, #tpu.memory_space<vmem>>, vector<8x32xf32>
      %c0_67 = arith.constant 0 : index
      %c0_68 = arith.constant 0 : index
      %159 = vector.load %arg18[%c0_67, %c0_68] : memref<8x32xf32, #tpu.memory_space<vmem>>, vector<8x32xf32>
      tpu.vector_store %arg18[%c0_67, %c0_68], %158 {strides = array<i32>} : memref<8x32xf32, #tpu.memory_space<vmem>>, vector<8x32xf32>,
    } else {
    }
    %c0 = arith.constant 0 : index
    %c0_1 = arith.constant 0 : index
    %3 = vector.load %arg18[%c0, %c0_1] : memref<8x32xf32, #tpu.memory_space<vmem>>, vector<8x32xf32>
    %c0_2 = arith.constant 0 : index
    %c0_3 = arith.constant 0 : index
    %c0_4 = arith.constant 0 : index
    %4 = vector.load %arg4[%c0_2, %c0_3, %c0_4] : memref<1x1x32xf32, #tpu.memory_space<vmem>>, vector<1x1x32xf32>
    %5 = vector.shape_cast %4 : vector<1x1x32xf32> to vector<1x32xf32>
    %c0_5 = arith.constant 0 : index
    %c0_6 = arith.constant 0 : index
    %c0_7 = arith.constant 0 : index
    %6 = vector.load %arg5[%c0_5, %c0_6, %c0_7] : memref<1x1x32xf32, #tpu.memory_space<vmem>>, vector<1x1x32xf32>
    %7 = vector.shape_cast %6 : vector<1x1x32xf32> to vector<1x32xf32>
    %cst = arith.constant dense<0.000000e+00> : vector<8xf32>
    %8 = vector.multi_reduction <add>, %3, %cst [1] : vector<8x32xf32> to vector<8xf32>
    %9 = vector.shape_cast %8 : vector<8xf32> to vector<8x1xf32>
    %cst_8 = arith.constant 3.200000e+01 : f32
    %10 = vector.broadcast %cst_8 : f32 to vector<8x1xf32>
    %11 = arith.divf %9, %10 : vector<8x1xf32>
    %12 = vector.broadcast %11 : vector<8x1xf32> to vector<8x32xf32>
    %13 = arith.subf %3, %12 : vector<8x32xf32>
    %14 = arith.mulf %13, %13 : vector<8x32xf32>
    %cst_9 = arith.constant dense<0.000000e+00> : vector<8xf32>
    %15 = vector.multi_reduction <add>, %14, %cst_9 [1] : vector<8x32xf32> to vector<8xf32>
    %16 = vector.shape_cast %15 : vector<8xf32> to vector<8x1xf32>
    %cst_10 = arith.constant 0.0322580636 : f32
    %17 = vector.broadcast %cst_10 : f32 to vector<8x1xf32>
    %18 = arith.mulf %16, %17 : vector<8x1xf32>
    %19 = math.sqrt %18 : vector<8x1xf32>
    %20 = vector.broadcast %5 : vector<1x32xf32> to vector<8x32xf32>
    %21 = arith.mulf %20, %13 : vector<8x32xf32>
    %cst_11 = arith.constant 9.99999997E-7 : f32
    %22 = vector.broadcast %cst_11 : f32 to vector<8x1xf32>
    %23 = arith.addf %19, %22 : vector<8x1xf32>
    %24 = vector.broadcast %23 : vector<8x1xf32> to vector<8x32xf32>
    %25 = arith.divf %21, %24 : vector<8x32xf32>
    %26 = vector.broadcast %7 : vector<1x32xf32> to vector<8x32xf32>
    %27 = arith.addf %25, %26 : vector<8x32xf32>
    %28 = arith.truncf %27 : vector<8x32xf32> to vector<8x32xbf16>
    %c0_12 = arith.constant 0 : index
    %c0_13 = arith.constant 0 : index
    %c0_14 = arith.constant 0 : index
    %29 = vector.load %arg6[%c0_12, %c0_13, %c0_14] : memref<1x32x96xbf16, #tpu.memory_space<vmem>>, vector<1x32x96xbf16>
    %30 = vector.shape_cast %29 : vector<1x32x96xbf16> to vector<32x96xbf16>
    %cst_15 = arith.constant dense<0.000000e+00> : vector<8x96xf32>
    %31 = tpu.matmul %28, %30, %cst_15 {dimension_numbers = #tpu.dot_dimension_numbers<[1], [0], [0], [1], [0, 0, 1, 1], [], []>} : vector<8x32xbf16>, vector<32x96xbf16>, vector<8x96xf32> -> vector<8x96xf32>
    %c0_16 = arith.constant 0 : index
    %c0_17 = arith.constant 0 : index
    %c0_18 = arith.constant 0 : index
    %32 = vector.load %arg7[%c0_16, %c0_17, %c0_18] : memref<1x1x96xf32, #tpu.memory_space<vmem>>, vector<1x1x96xf32>
    %33 = vector.shape_cast %32 : vector<1x1x96xf32> to vector<1x96xf32>
    %34 = vector.broadcast %33 : vector<1x96xf32> to vector<8x96xf32>
    %35 = arith.addf %31, %34 : vector<8x96xf32>
    %36 = vector.extract_strided_slice %35 {offsets = [0, 0], sizes = [8, 32], strides = [1, 1]} : vector<8x96xf32> to vector<8x32xf32>
    %cst_19 = arith.constant 0.353553385 : f32
    %37 = vector.broadcast %cst_19 : f32 to vector<8x32xf32>
    %38 = arith.mulf %36, %37 : vector<8x32xf32>
    %39 = vector.extract_strided_slice %35 {offsets = [0, 32], sizes = [8, 32], strides = [1, 1]} : vector<8x96xf32> to vector<8x32xf32>
    %40 = vector.extract_strided_slice %35 {offsets = [0, 64], sizes = [8, 32], strides = [1, 1]} : vector<8x96xf32> to vector<8x32xf32>
    %41 = vector.extract_strided_slice %38 {offsets = [0, 0], sizes = [8, 8], strides = [1, 1]} : vector<8x32xf32> to vector<8x8xf32>
    %42 = vector.extract_strided_slice %38 {offsets = [0, 8], sizes = [8, 8], strides = [1, 1]} : vector<8x32xf32> to vector<8x8xf32>
    %43 = vector.extract_strided_slice %38 {offsets = [0, 16], sizes = [8, 8], strides = [1, 1]} : vector<8x32xf32> to vector<8x8xf32>
    %44 = vector.extract_strided_slice %38 {offsets = [0, 24], sizes = [8, 8], strides = [1, 1]} : vector<8x32xf32> to vector<8x8xf32>
    %45 = vector.shape_cast %41 : vector<8x8xf32> to vector<1x8x8xf32>
    %46 = vector.shape_cast %42 : vector<8x8xf32> to vector<1x8x8xf32>
    %47 = vector.shape_cast %43 : vector<8x8xf32> to vector<1x8x8xf32>
    %48 = vector.shape_cast %44 : vector<8x8xf32> to vector<1x8x8xf32>
    %49 = tpu.concatenate %45, %46, %47, %48 in 0 : vector<1x8x8xf32>, vector<1x8x8xf32>, vector<1x8x8xf32>, vector<1x8x8xf32> -> vector<4x8x8xf32>
    %50 = arith.truncf %49 : vector<4x8x8xf32> to vector<4x8x8xbf16>
    %51 = vector.extract_strided_slice %39 {offsets = [0, 0], sizes = [8, 8], strides = [1, 1]} : vector<8x32xf32> to vector<8x8xf32>
    %52 = vector.extract_strided_slice %39 {offsets = [0, 8], sizes = [8, 8], strides = [1, 1]} : vector<8x32xf32> to vector<8x8xf32>
    %53 = vector.extract_strided_slice %39 {offsets = [0, 16], sizes = [8, 8], strides = [1, 1]} : vector<8x32xf32> to vector<8x8xf32>
    %54 = vector.extract_strided_slice %39 {offsets = [0, 24], sizes = [8, 8], strides = [1, 1]} : vector<8x32xf32> to vector<8x8xf32>
    %55 = vector.shape_cast %51 : vector<8x8xf32> to vector<1x8x8xf32>
    %56 = vector.shape_cast %52 : vector<8x8xf32> to vector<1x8x8xf32>
    %57 = vector.shape_cast %53 : vector<8x8xf32> to vector<1x8x8xf32>
    %58 = vector.shape_cast %54 : vector<8x8xf32> to vector<1x8x8xf32>
    %59 = tpu.concatenate %55, %56, %57, %58 in 0 : vector<1x8x8xf32>, vector<1x8x8xf32>, vector<1x8x8xf32>, vector<1x8x8xf32> -> vector<4x8x8xf32>
    %60 = arith.truncf %59 : vector<4x8x8xf32> to vector<4x8x8xbf16>
    %61 = vector.extract_strided_slice %40 {offsets = [0, 0], sizes = [8, 8], strides = [1, 1]} : vector<8x32xf32> to vector<8x8xf32>
    %62 = vector.extract_strided_slice %40 {offsets = [0, 8], sizes = [8, 8], strides = [1, 1]} : vector<8x32xf32> to vector<8x8xf32>
    %63 = vector.extract_strided_slice %40 {offsets = [0, 16], sizes = [8, 8], strides = [1, 1]} : vector<8x32xf32> to vector<8x8xf32>
    %64 = vector.extract_strided_slice %40 {offsets = [0, 24], sizes = [8, 8], strides = [1, 1]} : vector<8x32xf32> to vector<8x8xf32>
    %65 = vector.shape_cast %61 : vector<8x8xf32> to vector<1x8x8xf32>
    %66 = vector.shape_cast %62 : vector<8x8xf32> to vector<1x8x8xf32>
    %67 = vector.shape_cast %63 : vector<8x8xf32> to vector<1x8x8xf32>
    %68 = vector.shape_cast %64 : vector<8x8xf32> to vector<1x8x8xf32>
    %69 = tpu.concatenate %65, %66, %67, %68 in 0 : vector<1x8x8xf32>, vector<1x8x8xf32>, vector<1x8x8xf32>, vector<1x8x8xf32> -> vector<4x8x8xf32>
    %70 = arith.truncf %69 : vector<4x8x8xf32> to vector<4x8x8xbf16>
    "tpu.trace_start"() <{level = 10 : i32, message = "hqd,hkd->hqk"}> : () -> ()
    %cst_20 = arith.constant dense<0.000000e+00> : vector<4x8x8xf32>
    %71 = tpu.matmul %50, %60, %cst_20 {dimension_numbers = #tpu.dot_dimension_numbers<[2], [2], [1], [1], [0, 0, 0, 1, 1, 1], [0], [0]>} : vector<4x8x8xbf16>, vector<4x8x8xbf16>, vector<4x8x8xf32> -> vector<4x8x8xf32>
    "tpu.trace_stop"() : () -> ()
    %c0_21 = arith.constant 0 : index
    %c0_22 = arith.constant 0 : index
    %c0_23 = arith.constant 0 : index
    %72 = vector.load %arg3[%c0_21, %c0_22, %c0_23] : memref<1x8x8xf32, #tpu.memory_space<vmem>>, vector<1x8x8xf32>
    %73 = vector.shape_cast %72 : vector<1x8x8xf32> to vector<8x8xf32>
    %74 = vector.shape_cast %73 : vector<8x8xf32> to vector<1x8x8xf32>
    %cst_24 = arith.constant 0.000000e+00 : f32
    %75 = vector.broadcast %cst_24 : f32 to vector<1x8x8xf32>
    %76 = arith.cmpf oeq, %74, %75 : vector<1x8x8xf32>
    %cst_25 = arith.constant -1.000000e+09 : f32
    %77 = vector.shape_cast %76 : vector<1x8x8xi1> to vector<1x8x8xi1>
    %78 = vector.broadcast %77 : vector<1x8x8xi1> to vector<4x8x8xi1>
    %79 = vector.broadcast %cst_25 : f32 to vector<4x8x8xf32>
    %80 = arith.select %78, %79, %71 : vector<4x8x8xi1>, vector<4x8x8xf32>
    %cst_26 = arith.constant dense<0xFF800000> : vector<4x8xf32>
    %81 = vector.multi_reduction <maximumf>, %80, %cst_26 [2] : vector<4x8x8xf32> to vector<4x8xf32>
    %82 = vector.shape_cast %81 : vector<4x8xf32> to vector<4x8x1xf32>
    %83 = vector.broadcast %82 : vector<4x8x1xf32> to vector<4x8x8xf32>
    %84 = arith.subf %80, %83 : vector<4x8x8xf32>
    %85 = math.exp %84 : vector<4x8x8xf32>
    %cst_27 = arith.constant dense<0.000000e+00> : vector<4x8xf32>
    %86 = vector.multi_reduction <add>, %85, %cst_27 [2] : vector<4x8x8xf32> to vector<4x8xf32>
    %87 = vector.shape_cast %86 : vector<4x8xf32> to vector<4x8x1xf32>
    %88 = tpu.reciprocal %87 {approx = true} : vector<4x8x1xf32> -> vector<4x8x1xf32>
    %89 = vector.broadcast %88 : vector<4x8x1xf32> to vector<4x8x8xf32>
    %90 = arith.mulf %85, %89 : vector<4x8x8xf32>
    %91 = arith.truncf %90 : vector<4x8x8xf32> to vector<4x8x8xbf16>
    "tpu.trace_start"() <{level = 10 : i32, message = "hqk,hkd->hqd"}> : () -> ()
    %cst_28 = arith.constant dense<0.000000e+00> : vector<4x8x8xf32>
    %92 = tpu.matmul %91, %70, %cst_28 {dimension_numbers = #tpu.dot_dimension_numbers<[2], [1], [1], [2], [0, 0, 0, 1, 1, 2], [0], [0]>} : vector<4x8x8xbf16>, vector<4x8x8xbf16>, vector<4x8x8xf32> -> vector<4x8x8xf32>
    "tpu.trace_stop"() : () -> ()
    %93 = vector.extract_strided_slice %92 {offsets = [0, 0, 0], sizes = [1, 8, 8], strides = [1, 1, 1]} : vector<4x8x8xf32> to vector<1x8x8xf32>
    %94 = vector.shape_cast %93 : vector<1x8x8xf32> to vector<8x8xf32>
    %95 = vector.extract_strided_slice %92 {offsets = [1, 0, 0], sizes = [1, 8, 8], strides = [1, 1, 1]} : vector<4x8x8xf32> to vector<1x8x8xf32>
    %96 = vector.shape_cast %95 : vector<1x8x8xf32> to vector<8x8xf32>
    %97 = vector.extract_strided_slice %92 {offsets = [2, 0, 0], sizes = [1, 8, 8], strides = [1, 1, 1]} : vector<4x8x8xf32> to vector<1x8x8xf32>
    %98 = vector.shape_cast %97 : vector<1x8x8xf32> to vector<8x8xf32>
    %99 = vector.extract_strided_slice %92 {offsets = [3, 0, 0], sizes = [1, 8, 8], strides = [1, 1, 1]} : vector<4x8x8xf32> to vector<1x8x8xf32>
    %100 = vector.shape_cast %99 : vector<1x8x8xf32> to vector<8x8xf32>
    %101 = tpu.concatenate %94, %96, %98, %100 in 1 : vector<8x8xf32>, vector<8x8xf32>, vector<8x8xf32>, vector<8x8xf32> -> vector<8x32xf32>
    %102 = arith.truncf %101 : vector<8x32xf32> to vector<8x32xbf16>
    %c0_29 = arith.constant 0 : index
    %c0_30 = arith.constant 0 : index
    %c0_31 = arith.constant 0 : index
    %103 = vector.load %arg8[%c0_29, %c0_30, %c0_31] : memref<1x32x32xbf16, #tpu.memory_space<vmem>>, vector<1x32x32xbf16>
    %104 = vector.shape_cast %103 : vector<1x32x32xbf16> to vector<32x32xbf16>
    %cst_32 = arith.constant dense<0.000000e+00> : vector<8x32xf32>
    %105 = tpu.matmul %102, %104, %cst_32 {dimension_numbers = #tpu.dot_dimension_numbers<[1], [0], [0], [1], [0, 0, 1, 1], [], []>} : vector<8x32xbf16>, vector<32x32xbf16>, vector<8x32xf32> -> vector<8x32xf32>
    %c0_33 = arith.constant 0 : index
    %c0_34 = arith.constant 0 : index
    %c0_35 = arith.constant 0 : index
    %106 = vector.load %arg9[%c0_33, %c0_34, %c0_35] : memref<1x1x32xf32, #tpu.memory_space<vmem>>, vector<1x1x32xf32>
    %107 = vector.shape_cast %106 : vector<1x1x32xf32> to vector<1x32xf32>
    %108 = vector.broadcast %107 : vector<1x32xf32> to vector<8x32xf32>
    %109 = arith.addf %105, %108 : vector<8x32xf32>
    %110 = arith.addf %3, %109 : vector<8x32xf32>
    %c0_36 = arith.constant 0 : index
    %c0_37 = arith.constant 0 : index
    %c0_38 = arith.constant 0 : index
    %111 = vector.load %arg10[%c0_36, %c0_37, %c0_38] : memref<1x1x32xf32, #tpu.memory_space<vmem>>, vector<1x1x32xf32>
    %112 = vector.shape_cast %111 : vector<1x1x32xf32> to vector<1x32xf32>
    %c0_39 = arith.constant 0 : index
    %c0_40 = arith.constant 0 : index
    %c0_41 = arith.constant 0 : index
    %113 = vector.load %arg11[%c0_39, %c0_40, %c0_41] : memref<1x1x32xf32, #tpu.memory_space<vmem>>, vector<1x1x32xf32>
    %114 = vector.shape_cast %113 : vector<1x1x32xf32> to vector<1x32xf32>
    %cst_42 = arith.constant dense<0.000000e+00> : vector<8xf32>
    %115 = vector.multi_reduction <add>, %110, %cst_42 [1] : vector<8x32xf32> to vector<8xf32>
    %116 = vector.shape_cast %115 : vector<8xf32> to vector<8x1xf32>
    %cst_43 = arith.constant 3.200000e+01 : f32
    %117 = vector.broadcast %cst_43 : f32 to vector<8x1xf32>
    %118 = arith.divf %116, %117 : vector<8x1xf32>
    %119 = vector.broadcast %118 : vector<8x1xf32> to vector<8x32xf32>
    %120 = arith.subf %110, %119 : vector<8x32xf32>
    %121 = arith.mulf %120, %120 : vector<8x32xf32>
    %cst_44 = arith.constant dense<0.000000e+00> : vector<8xf32>
    %122 = vector.multi_reduction <add>, %121, %cst_44 [1] : vector<8x32xf32> to vector<8xf32>
    %123 = vector.shape_cast %122 : vector<8xf32> to vector<8x1xf32>
    %cst_45 = arith.constant 0.0322580636 : f32
    %124 = vector.broadcast %cst_45 : f32 to vector<8x1xf32>
    %125 = arith.mulf %123, %124 : vector<8x1xf32>
    %126 = math.sqrt %125 : vector<8x1xf32>
    %127 = vector.broadcast %112 : vector<1x32xf32> to vector<8x32xf32>
    %128 = arith.mulf %127, %120 : vector<8x32xf32>
    %cst_46 = arith.constant 9.99999997E-7 : f32
    %129 = vector.broadcast %cst_46 : f32 to vector<8x1xf32>
    %130 = arith.addf %126, %129 : vector<8x1xf32>
    %131 = vector.broadcast %130 : vector<8x1xf32> to vector<8x32xf32>
    %132 = arith.divf %128, %131 : vector<8x32xf32>
    %133 = vector.broadcast %114 : vector<1x32xf32> to vector<8x32xf32>
    %134 = arith.addf %132, %133 : vector<8x32xf32>
    %135 = arith.truncf %134 : vector<8x32xf32> to vector<8x32xbf16>
    %c0_47 = arith.constant 0 : index
    %c0_48 = arith.constant 0 : index
    %c0_49 = arith.constant 0 : index
    %136 = vector.load %arg12[%c0_47, %c0_48, %c0_49] : memref<1x32x64xbf16, #tpu.memory_space<vmem>>, vector<1x32x64xbf16>
    %137 = vector.shape_cast %136 : vector<1x32x64xbf16> to vector<32x64xbf16>
    %cst_50 = arith.constant dense<0.000000e+00> : vector<8x64xf32>
    %138 = tpu.matmul %135, %137, %cst_50 {dimension_numbers = #tpu.dot_dimension_numbers<[1], [0], [0], [1], [0, 0, 1, 1], [], []>} : vector<8x32xbf16>, vector<32x64xbf16>, vector<8x64xf32> -> vector<8x64xf32>
    %c0_51 = arith.constant 0 : index
    %c0_52 = arith.constant 0 : index
    %c0_53 = arith.constant 0 : index
    %139 = vector.load %arg13[%c0_51, %c0_52, %c0_53] : memref<1x1x64xf32, #tpu.memory_space<vmem>>, vector<1x1x64xf32>
    %140 = vector.shape_cast %139 : vector<1x1x64xf32> to vector<1x64xf32>
    %141 = vector.broadcast %140 : vector<1x64xf32> to vector<8x64xf32>
    %142 = arith.addf %138, %141 : vector<8x64xf32>
    %cst_54 = arith.constant 0.000000e+00 : f32
    %143 = vector.broadcast %cst_54 : f32 to vector<8x64xf32>
    %144 = arith.maximumf %142, %143 : vector<8x64xf32>
    %145 = arith.truncf %144 : vector<8x64xf32> to vector<8x64xbf16>
    %c0_55 = arith.constant 0 : index
    %c0_56 = arith.constant 0 : index
    %c0_57 = arith.constant 0 : index
    %146 = vector.load %arg14[%c0_55, %c0_56, %c0_57] : memref<1x64x32xbf16, #tpu.memory_space<vmem>>, vector<1x64x32xbf16>
    %147 = vector.shape_cast %146 : vector<1x64x32xbf16> to vector<64x32xbf16>
    %cst_58 = arith.constant dense<0.000000e+00> : vector<8x32xf32>
    %148 = tpu.matmul %145, %147, %cst_58 {dimension_numbers = #tpu.dot_dimension_numbers<[1], [0], [0], [1], [0, 0, 1, 1], [], []>} : vector<8x64xbf16>, vector<64x32xbf16>, vector<8x32xf32> -> vector<8x32xf32>
    %c0_59 = arith.constant 0 : index
    %c0_60 = arith.constant 0 : index
    %c0_61 = arith.constant 0 : index
    %149 = vector.load %arg15[%c0_59, %c0_60, %c0_61] : memref<1x1x32xf32, #tpu.memory_space<vmem>>, vector<1x1x32xf32>
    %150 = vector.shape_cast %149 : vector<1x1x32xf32> to vector<1x32xf32>
    %151 = vector.broadcast %150 : vector<1x32xf32> to vector<8x32xf32>
    %152 = arith.addf %148, %151 : vector<8x32xf32>
    %153 = arith.addf %110, %152 : vector<8x32xf32>
    %c0_62 = arith.constant 0 : index
    %c0_63 = arith.constant 0 : index
    %154 = vector.load %arg18[%c0_62, %c0_63] : memref<8x32xf32, #tpu.memory_space<vmem>>, vector<8x32xf32>
    tpu.vector_store %arg18[%c0_62, %c0_63], %153 {strides = array<i32>} : memref<8x32xf32, #tpu.memory_space<vmem>>, vector<8x32xf32>,
    %c1_i32 = arith.constant 1 : i32
    %155 = arith.cmpi eq, %arg1, %c1_i32 : i32
    %156 = arith.extui %155 : i1 to i32
    %c0_i32_64 = arith.constant 0 : i32
    %157 = arith.cmpi ne, %156, %c0_i32_64 : i32
    scf.if %157 {
      %c0_65 = arith.constant 0 : index
      %c0_66 = arith.constant 0 : index
      %158 = vector.load %arg16[%c0_65, %c0_66] : memref<1x32xf32, #tpu.memory_space<vmem>>, vector<1x32xf32>
      %c0_67 = arith.constant 0 : index
      %c0_68 = arith.constant 0 : index
      %159 = vector.load %arg17[%c0_67, %c0_68] : memref<1x32xf32, #tpu.memory_space<vmem>>, vector<1x32xf32>
      %cst_69 = arith.constant dense<0.000000e+00> : vector<8xf32>
      %160 = vector.multi_reduction <add>, %153, %cst_69 [1] : vector<8x32xf32> to vector<8xf32>
      %161 = vector.shape_cast %160 : vector<8xf32> to vector<8x1xf32>
      %cst_70 = arith.constant 3.200000e+01 : f32
      %162 = vector.broadcast %cst_70 : f32 to vector<8x1xf32>
      %163 = arith.divf %161, %162 : vector<8x1xf32>
      %164 = vector.broadcast %163 : vector<8x1xf32> to vector<8x32xf32>
      %165 = arith.subf %153, %164 : vector<8x32xf32>
      %166 = arith.mulf %165, %165 : vector<8x32xf32>
      %cst_71 = arith.constant dense<0.000000e+00> : vector<8xf32>
      %167 = vector.multi_reduction <add>, %166, %cst_71 [1] : vector<8x32xf32> to vector<8xf32>
      %168 = vector.shape_cast %167 : vector<8xf32> to vector<8x1xf32>
      %cst_72 = arith.constant 0.0322580636 : f32
      %169 = vector.broadcast %cst_72 : f32 to vector<8x1xf32>
      %170 = arith.mulf %168, %169 : vector<8x1xf32>
      %171 = math.sqrt %170 : vector<8x1xf32>
      %172 = vector.broadcast %158 : vector<1x32xf32> to vector<8x32xf32>
      %173 = arith.mulf %172, %165 : vector<8x32xf32>
      %cst_73 = arith.constant 9.99999997E-7 : f32
      %174 = vector.broadcast %cst_73 : f32 to vector<8x1xf32>
      %175 = arith.addf %171, %174 : vector<8x1xf32>
      %176 = vector.broadcast %175 : vector<8x1xf32> to vector<8x32xf32>
      %177 = arith.divf %173, %176 : vector<8x32xf32>
      %178 = vector.broadcast %159 : vector<1x32xf32> to vector<8x32xf32>
      %179 = arith.addf %177, %178 : vector<8x32xf32>
      %c0_74 = arith.constant 0 : index
      %c0_75 = arith.constant 0 : index
      %180 = vector.load %arg18[%c0_74, %c0_75] : memref<8x32xf32, #tpu.memory_space<vmem>>, vector<8x32xf32>
      tpu.vector_store %arg18[%c0_74, %c0_75], %179 {strides = array<i32>} : memref<8x32xf32, #tpu.memory_space<vmem>>, vector<8x32xf32>,
    } else {
    }
    return
  }
  func.func @transform_0(%arg0: i32, %arg1: i32) -> (i32, i32) {
    %c0_i32 = arith.constant 0 : i32
    %c0_i32_0 = arith.constant 0 : i32
    return %arg0, %c0_i32 : i32, i32
  }
  func.func @transform_1(%arg0: i32, %arg1: i32) -> (i32, i32, i32) {
    %c0_i32 = arith.constant 0 : i32
    %c0_i32_0 = arith.constant 0 : i32
    %c0_i32_1 = arith.constant 0 : i32
    return %arg0, %c0_i32, %c0_i32_0 : i32, i32, i32
  }
  func.func @transform_2(%arg0: i32, %arg1: i32) -> (i32, i32, i32) {
    %c0_i32 = arith.constant 0 : i32
    %c0_i32_0 = arith.constant 0 : i32
    %c0_i32_1 = arith.constant 0 : i32
    return %arg1, %c0_i32, %c0_i32_0 : i32, i32, i32
  }
  func.func @transform_3(%arg0: i32, %arg1: i32) -> (i32, i32, i32) {
    %c0_i32 = arith.constant 0 : i32
    %c0_i32_0 = arith.constant 0 : i32
    %c0_i32_1 = arith.constant 0 : i32
    return %arg1, %c0_i32, %c0_i32_0 : i32, i32, i32
  }
  func.func @transform_4(%arg0: i32, %arg1: i32) -> (i32, i32, i32) {
    %c0_i32 = arith.constant 0 : i32
    %c0_i32_0 = arith.constant 0 : i32
    %c0_i32_1 = arith.constant 0 : i32
    return %arg1, %c0_i32, %c0_i32_0 : i32, i32, i32
  }
  func.func @transform_5(%arg0: i32, %arg1: i32) -> (i32, i32, i32) {
    %c0_i32 = arith.constant 0 : i32
    %c0_i32_0 = arith.constant 0 : i32
    %c0_i32_1 = arith.constant 0 : i32
    return %arg1, %c0_i32, %c0_i32_0 : i32, i32, i32
  }
  func.func @transform_6(%arg0: i32, %arg1: i32) -> (i32, i32, i32) {
    %c0_i32 = arith.constant 0 : i32
    %c0_i32_0 = arith.constant 0 : i32
    %c0_i32_1 = arith.constant 0 : i32
    return %arg1, %c0_i32, %c0_i32_0 : i32, i32, i32
  }
  func.func @transform_7(%arg0: i32, %arg1: i32) -> (i32, i32, i32) {
    %c0_i32 = arith.constant 0 : i32
    %c0_i32_0 = arith.constant 0 : i32
    %c0_i32_1 = arith.constant 0 : i32
    return %arg1, %c0_i32, %c0_i32_0 : i32, i32, i32
  }
  func.func @transform_8(%arg0: i32, %arg1: i32) -> (i32, i32, i32) {
    %c0_i32 = arith.constant 0 : i32
    %c0_i32_0 = arith.constant 0 : i32
    %c0_i32_1 = arith.constant 0 : i32
    return %arg1, %c0_i32, %c0_i32_0 : i32, i32, i32
  }
  func.func @transform_9(%arg0: i32, %arg1: i32) -> (i32, i32, i32) {
    %c0_i32 = arith.constant 0 : i32
    %c0_i32_0 = arith.constant 0 : i32
    %c0_i32_1 = arith.constant 0 : i32
    return %arg1, %c0_i32, %c0_i32_0 : i32, i32, i32
  }
  func.func @transform_10(%arg0: i32, %arg1: i32) -> (i32, i32, i32) {
    %c0_i32 = arith.constant 0 : i32
    %c0_i32_0 = arith.constant 0 : i32
    %c0_i32_1 = arith.constant 0 : i32
    return %arg1, %c0_i32, %c0_i32_0 : i32, i32, i32
  }
  func.func @transform_11(%arg0: i32, %arg1: i32) -> (i32, i32, i32) {
    %c0_i32 = arith.constant 0 : i32
    %c0_i32_0 = arith.constant 0 : i32
    %c0_i32_1 = arith.constant 0 : i32
    return %arg1, %c0_i32, %c0_i32_0 : i32, i32, i32
  }
  func.func @transform_12(%arg0: i32, %arg1: i32) -> (i32, i32, i32) {
    %c0_i32 = arith.constant 0 : i32
    %c0_i32_0 = arith.constant 0 : i32
    %c0_i32_1 = arith.constant 0 : i32
    return %arg1, %c0_i32, %c0_i32_0 : i32, i32, i32
  }
  func.func @transform_13(%arg0: i32, %arg1: i32) -> (i32, i32, i32) {
    %c0_i32 = arith.constant 0 : i32
    %c0_i32_0 = arith.constant 0 : i32
    %c0_i32_1 = arith.constant 0 : i32
    return %arg1, %c0_i32, %c0_i32_0 : i32, i32, i32
  }
  func.func @transform_14(%arg0: i32, %arg1: i32) -> (i32, i32) {
    %c0_i32 = arith.constant 0 : i32
    %c0_i32_0 = arith.constant 0 : i32
    %c0_i32_1 = arith.constant 0 : i32
    return %c0_i32, %c0_i32_0 : i32, i32
  }
  func.func @transform_15(%arg0: i32, %arg1: i32) -> (i32, i32) {
    %c0_i32 = arith.constant 0 : i32
    %c0_i32_0 = arith.constant 0 : i32
    %c0_i32_1 = arith.constant 0 : i32
    return %c0_i32, %c0_i32_0 : i32, i32
  }
  func.func @transform_16(%arg0: i32, %arg1: i32) -> (i32, i32) {
    %c0_i32 = arith.constant 0 : i32
    %c0_i32_0 = arith.constant 0 : i32
    return %arg0, %c0_i32 : i32, i32
  }
}

</mosaic_0001>

<bundles_post_ra>
// kernel: decoder_forward.1
= control target key start
LH: loop header
LB: loop body
LE: loop exit
PB: predicated region body
PF: predicated region fallthrough
CT: control target
= control target key end

     0   :  { %s2708_s0 = inlined_call_operand.vmem [shape: f32[16,32], index: 0, kind: input, shape index: {}]   ;;  %s2709_s1 = inlined_call_operand.vmem [shape: f32[2,8,8], index: 1, kind: input, shape index: {}]   ;;  %s2710_s2 = inlined_call_operand.vmem [shape: f32[2,1,32], index: 2, kind: input, shape index: {}]   ;;  %s2711_s3 = inlined_call_operand.vmem [shape: f32[2,1,32], index: 3, kind: input, shape index: {}]   ;;  %s2712_s4 = inlined_call_operand.vmem [shape: bf16[2,32,96], index: 4, kind: input, shape index: {}]   ;;  %s2713_s5 = inlined_call_operand.vmem [shape: f32[2,1,96], index: 5, kind: input, shape index: {}]   ;;  %s2714_s6 = inlined_call_operand.vmem [shape: bf16[2,32,32], index: 6, kind: input, shape index: {}]   ;;  %s2715_s7 = inlined_call_operand.vmem [shape: f32[2,1,32], index: 7, kind: input, shape index: {}]   ;;  %s2716_s8 = inlined_call_operand.vmem [shape: f32[2,1,32], index: 8, kind: input, shape index: {}]   ;;  %s2717_s9 = inlined_call_operand.vmem [shape: f32[2,1,32], index: 9, kind: input, shape index: {}]   ;;  %s2718_s10 = inlined_call_operand.vmem [shape: bf16[2,32,64], index: 10, kind: input, shape index: {}]   ;;  %s2719_s11 = inlined_call_operand.vmem [shape: f32[2,1,64], index: 11, kind: input, shape index: {}]   ;;  %s2720_s12 = inlined_call_operand.vmem [shape: bf16[2,64,32], index: 12, kind: input, shape index: {}]   ;;  %s2721_s13 = inlined_call_operand.vmem [shape: f32[2,1,32], index: 13, kind: input, shape index: {}]   ;;  %s2722_s14 = inlined_call_operand.vmem [shape: f32[1,32], index: 14, kind: input, shape index: {}]   ;;  %s2723_s15 = inlined_call_operand.vmem [shape: f32[1,32], index: 15, kind: input, shape index: {}]   ;;  %s2724_s16 = inlined_call_operand.hbm [shape: f32[16,32], index: 16, kind: output, shape index: {}]  }
   0x1   :  { %2740 = sst [smem:[#allocation18_spill]] %s2708_s0 }
   0x2   :  { %2741 = sst [smem:[#allocation19_spill]] %s2709_s1 }
   0x3   :  { %2742 = sst [smem:[#allocation20_spill]] %s2712_s4 }
   0x4   :  { %2743 = sst [smem:[#allocation21_spill]] %s2714_s6 }
   0x5   :  { %2744 = sst [smem:[#allocation22_spill]] %s2715_s7 }
   0x6   :  { %2745 = sst [smem:[#allocation23_spill]] %s2720_s12 }
   0x7   :  { %2746 = sst [smem:[#allocation24_spill]] %s2721_s13 }
   0x8   :  { %2747 = sst [smem:[#allocation25_spill]] %s2722_s14 }
   0x9   :  { %2748 = sst [smem:[#allocation26_spill]] %s2723_s15 }
   0xa   :  { %2749 = sst [smem:[#allocation27_spill]] %s2724_s16 }
   0xb   :  { %21 = vsyncpa [#allocation3], 0 }
   0xc   :  { %23 = vsyncpa [#allocation3 + $0x1], 0  ;;  %s2342_s21 = smov 0   ;;  %s2344_s22 = smov 0  }
   0xd   :  { %s2346_s23 = smov 0   ;;  %s2348_s24 = smov 0  }
   0xe   :  { %s2350_s25 = smov 0   ;;  %s2352_s26 = smov 0  }
   0xf   :  { %s2354_s27 = smov 0   ;;  %s2356_s28 = smov 0  }
  0x10 LB: > { %2750 = sst [smem:[#allocation5_spill]] %s2216_s21  ;;  %s1859_s29 = sadd.s32 4294967295, %s2244_s28   ;;  %s2244_s28 = sphi %s2356_s28, %s29_s28   ;;  %s2240_s27 = sphi %s2354_s27, %s2799_s27   ;;  %s2236_s26 = sphi %s2352_s26, %s2798_s26   ;;  %s2232_s25 = sphi %s2350_s25, %s2797_s25   ;;  %s2228_s24 = sphi %s2348_s24, %s2796_s24   ;;  %s2224_s23 = sphi %s2346_s23, %s2795_s23   ;;  %s2220_s22 = sphi %s2344_s22, %s2794_s22   ;;  %s2216_s21 = sphi %s2342_s21, %s2793_s21  }
  0x11   : > { %2751 = sst [smem:[#allocation6_spill]] %s2220_s22  ;;  %s1860_s30 = sadd.s32 4294967294, %s2244_s28  }
  0x12   : > { %2752 = sst [smem:[#allocation7_spill]] %s2224_s23  ;;  %s38_s0 = sadd.s32 1, %s2236_s26 }
  0x13   : > { %2753 = sst [smem:[#allocation8_spill]] %s2228_s24  ;;  %p39_p0 = scmp.ge.s32.totalorder %s38_s0, 2 }
  0x14   : > { %2754 = sst [smem:[#allocation9_spill]] %s2232_s25  ;;  %s41_s17 = sadd.s32 1, %s2240_s27 }
  0x15   : > { %2755 = sst [smem:[#allocation10_spill]] %s2236_s26  ;;  %p464_p1 = scmp.ne.s32.totalorder %s2224_s23, %s2220_s22 }
  0x16   : > { %2756 = sst [smem:[#allocation11_spill]] %s2240_s27  ;;  %p465_p2 = scmp.eq.s32.totalorder %s1859_s29, 3 }
  0x17   : > { %2757 = sst [smem:[#allocation12_spill]] %s2244_s28  ;;  %s2801_s0 = smov (%p39_p0, %s38_s0), 0 }
  0x18   : > { %2758 = sst [smem:[#allocation13_spill]] %s2801_s0  ;;  %s2803_s17 = smov (!%p39_p0, %s41_s17), %s2240_s27 }
  0x19   : > { %p2391_p3 = por %p465_p2, %p464_p1  ;;  %p470_p4 = scmp.ne.s32.totalorder %s2220_s22, %s2216_s21 }
  0x1a   : > { %p43_p5 = scmp.ge.s32.totalorder %s2803_s17, 2  ;;  %p471_p6 = scmp.eq.s32.totalorder %s1860_s30, 3 }
  0x1b   : > { %s2759_s18 = scalar_select %p2391_p3, 1, 0 }
  0x1c   : > { %p1863_p7 = scmp.ge.s32.totalorder %s2244_s28, 1  ;;  %p589_p8 = scmp.lt.s32.totalorder %s2244_s28, 5 }
  0x1d   : > { %2760 = sst [smem:[#allocation14_spill]] %s2759_s18  ;;  %s2805_s17 = smov (%p43_p5, %s2803_s17), 0 }
  0x1e   : > { %2761 = sst [smem:[#allocation15_spill]] %s2805_s17  ;;  %p2401_p9 = por %p471_p6, %p470_p4 }
  0x1f   : > { %p590_p10 = pnand %p1863_p7, %p589_p8  ;;  %s451_s20 = ssub.s32 %s2240_s27, %s2805_s17 }
  0x20   : > { %s2762_s19 = scalar_select %p2401_p9, 1, 0 }
  0x21   : > { %s454_s29 = sadd.s32 1, %s2224_s23  ;;  %p452_p11 = scmp.eq.s32.totalorder %s451_s20, 0 }
  0x22   : > { %2763 = sst [smem:[#allocation16_spill]] %s2762_s19  ;;  %593 = sbr.rel (%p590_p10) target bundleno = 3045 (0xbe5), region = 84 }
  0x23   : > { %s2409_s0 = scalar_select %p452_p11, %s2224_s23, %s454_s29  }
  0x24   : > { %s2730_s30 = sand.u32 (!%p590_p10), 1, %s2220_s22   ;;  %p686_p12 = scmp.lt.s32.totalorder (!%p590_p10), %s2232_s25, 1 }
  0x25   : > { %2764 = sst [smem:[#allocation17_spill]] %s2409_s0  ;;  %s1864_s26 = sshll.u32 (!%p590_p10), %s2730_s30, 3 }
  0x26   : > { %p694_p13 = scmp.lt.s32.totalorder (!%p590_p10), %s2228_s24, 1  ;;  %s2765_s27 = sld [smem:[#allocation18_spill]] (!%p590_p10) }
  0x27   : > { %s2766_s1 = sld [smem:[#allocation19_spill]] (!%p590_p10)  ;;  %s2767_s4 = sld [smem:[#allocation20_spill]] (!%p590_p10) }
  0x28   : > { %s2768_s6 = sld [smem:[#allocation21_spill]] (!%p590_p10)  ;;  %s2770_s15 = sld [smem:[#allocation23_spill]] (!%p590_p10) }
  0x29   : > { %s687_s21 = scalar_select %p686_p12, %s2232_s25, 1 }
  0x2a   : > { %s2418_s19 = scalar_select %p694_p13, %s2228_s24, 1 }
  0x2b   : > { %s1865_s20 = sshll.u32 %s687_s21, 3  ;;  %s2771_s22 = sld [smem:[#allocation24_spill]] }
  0x2c   : > { %s689_s0 = scalar_lea.vmem %s2765_s27, %s1865_s20  ;;  %s1913_s24 = sshll.u32 %s2418_s19, 4 }
  0x2d   : > { %s2426_s28 = scalar_lea.vmem %s2766_s1, %s1865_s20  ;;  %s2444_s12 = scalar_lea.vmem %s2767_s4, %s1913_s24 }
  0x2e   : > { %s2449_s20 = scalar_lea.vmem %s2768_s6, %s1913_s24  ;;  %s2466_s1 = scalar_lea.vmem %s2718_s10, %s1913_s24 }
  0x2f   : > { %s729_s4 = scalar_lea.vmem %s2719_s11, %s2418_s19  ;;  %s1916_s6 = sshll.u32 %s2418_s19, 5 }
  0x30   : > { %s2476_s7 = scalar_lea.vmem %s2770_s15, %s1916_s6  ;;  %s2482_s21 = scalar_lea.vmem [#allocation2], %s1864_s26 }
  0x31   : > { %s737_s13 = scalar_lea.vmem %s2771_s22, %s2418_s19  ;;  %s2772_s17 = sld [smem:[#allocation8_spill]] }
  0x37   : > { %p1875_p0 = scmp.ne.s32.totalorder %s2772_s17, 0 }
  0x38   : > { %v743_v0 = vld [vmem:[%s689_s0] sm:$0xff] (!%p1875_p0)  ;;  %vm744_vm0 = vcmask (!%p1875_p0), 261120  }
  0x39   : > { %742 = sbr.rel (%p1875_p0) target bundleno = 64 (0x40), region = 88  ;;  %745 = vst.msk [vmem:[%s2482_s21] sm:$0xff] (!%p1875_p0), %vm744_vm0, %v743_v0 }
  0x40 PF: > { %v2487_v1 = vld [vmem:[%s2482_s21] sm:$0xff]  ;;  %vm749_vm1 = vcmask 261120   ;;  %v2246_v9 = vmov 0.0   ;;  %vm2247_vm2 = vmmov 0   ;;  %s2773_s22 = scalar_lea.vmem %s2710_s2, %s2418_s19  ;;  %s2774_s0 = scalar_lea.vmem %s2711_s3, %s2418_s19  ;;  %vm884_vm5 = vcmask 64512  }
  0x41   : > { %v750_v2 = vsel %vm749_vm1, %v2487_v1, 0.0  ;;  %v2112_v8 = vld [vmem:[%s2444_s12] sm:$0xff]   ;;  %1947 = vmatprep.subr.bf16.mxu0 %v2246_v9  ;;  %1951 = vmatprep.mubr.msk.bf16.mxu0 %vm2247_vm2, %v2246_v9  ;;  %v2113_v10 = vld [vmem:[%s2444_s12 + $0x8] sm:$0xff]   ;;  %s2775_s29 = scalar_lea.vmem %s2713_s5, %s2418_s19  ;;  %s2248_s27 = smov 104   ;;  %vm1139_vm7 = vcmask 1043456   ;;  %vm1340_vm8 = vcmask 130048  }
  0x42   : > { %751 = vadd.xlane.f32.xlu0 %v750_v2  ;;  %1948 = vmatpush3.bf16.msra.mxu0 %v2112_v8  ;;  %v1876_v19 = vld [vmem:[%s2773_s22] ss:$0 sm:$0xff]  ;;  %s2249_s23 = smov 120   ;;  %s2250_s30 = smov 112   ;;  %vm1342_vm9 = vcmask 195584   ;;  %vm1556_vm12 = vcmask 523264  }
  0x43   : > { %1955 = vmatprep.subr.bf16.mxu1 %v2246_v9  ;;  %1949 = vmatprep.subr.bf16.mxu0 %v2246_v9  ;;  %v1877_v22 = vld [vmem:[%s2774_s0] ss:$0 sm:$0xff]  ;;  %s2251_s16 = smov 96   ;;  %s2253_s18 = smov 8  }
  0x44   : > { %1957 = vmatprep.mubr.msk.bf16.mxu1 %vm2247_vm2, %v2246_v9  ;;  %v1878_v26 = vld [vmem:[%s2775_s29] ss:$0 sm:$0xff]  ;;  %s2254_s14 = smov 16   ;;  %s2255_s25 = smov 24  }
  0x45   : > { %v1078_v55 = vld [vmem:[%s2426_s28] sm:$0xff]  ;;  %s2252_s28 = smov 64   ;;  %s2776_s12 = sld [smem:[#allocation22_spill]] }
  0x46   : > { %1950 = vmatpush3.bf16.msra.mxu0 %v2113_v10  ;;  %vm1079_vm6 = vcmp.eq.f32.partialorder %v1078_v55, 0.0  ;;  %s2778_s26 = scalar_lea.vmem %s2716_s8, %s2418_s19  ;;  %s2779_s15 = scalar_lea.vmem %s2717_s9, %s2418_s19 }
  0x47   : > { %1961 = vmatprep.subr.bf16.mxu0 %v2246_v9 }
  0x4b   : > { %s2777_s22 = scalar_lea.vmem %s2776_s12, %s2418_s19 }
  0xcf   : > { %v752_v3 = vpop.xlane.xlu0 %751 }
  0xd0   : > { %v754_v4 = vmul.f32 0.03125, %v752_v3 }
  0xd2   : > { %v755_v5 = vsub.f32 %v2487_v1, %v754_v4 }
  0xd4   : > { %v756_v6 = vmul.f32 %v755_v5, %v755_v5  ;;  %v774_v20 = vmul.f32 %v1876_v19, %v755_v5 }
  0xd6   : > { %v757_v7 = vsel %vm749_vm1, %v756_v6, 0.0 }
  0xd7   : > { %758 = vadd.xlane.f32.xlu0 %v757_v7 }
 0x164   : > { %v759_v11 = vpop.xlane.xlu0 %758 }
 0x165   : > { %v760_v12 = vmul.f32 0.032258064, %v759_v11 }
 0x167   : > { %2122 = vrsqrt.f32 %v760_v12  ;;  %vm763_vm3 = vcmp.eq.f32.partialorder %v760_v12, inf  ;;  %v766_v15 = vand.u32 2147483648, %v760_v12  ;;  %vm765_vm4 = vcmp.eq.f32.partialorder %v760_v12, 0.0 }
 0x171   : > { %v2123_v13 = vpop.eup %2122 }
 0x172   : > { %v762_v14 = vmul.f32 %v2123_v13, %v760_v12 }
 0x174   : > { %v764_v16 = vsel %vm763_vm3, %v760_v12, %v762_v14 }
 0x175   : > { %v767_v17 = vsel %vm765_vm4, %v766_v15, %v764_v16 }
 0x176   : > { %v775_v18 = vadd.f32 1e-06, %v767_v17 }
 0x178   : > { %2124 = vrcp.f32 %v775_v18 }
 0x182   : > { %v2125_v21 = vpop.eup %2124 }
 0x183   : > { %v777_v23 = vmul.f32 %v2125_v21, %v774_v20 }
 0x185   : > { %v784_v24 = vadd.f32 %v1877_v22, %v777_v23 }
 0x187   : > { %v785_v25 = vpack.c.bf16 %v784_v24, %v784_v24 }
 0x189   : > { %1952 = vmatmul.mubr.msk.bf16.vlgmr.msra.gmra.mrb[0].mxu0 %vm749_vm1, %v785_v25 }
 0x18a   : > { %1963 = vmatprep.mubr.msk.bf16.mxu0 %vm2247_vm2, %v2246_v9 }
 0x25c   : > { %v846_v27 = vpop.f32.mrb[0].mxu0 }
 0x25d   : > { %v847_v28 = vadd.f32 %v1878_v26, %v846_v27  ;;  %v1953_v29 = vpop.f32.mrb[1].mxu0 }
 0x25e   : > { %v849_v30 = vpop.f32.mrb[2].mxu0 }
 0x25f   : > { %874 = vrot.lane.b32.xlu0 %v847_v28, %s2248_s27  ;;  %868 = vrot.lane.b32.xlu1 %v847_v28, %s2249_s23  ;;  %v1954_v31 = vpop.f32.mrb[3].mxu0  ;;  %v852_v32 = vmul.f32 0.35355338, %v847_v28  ;;  %v2521_v33 = vpack.c.bf16 %v847_v28, %v847_v28 }
 0x261   : > { %v863_v42 = vpack.c.bf16 %v852_v32, %v852_v32 }
 0x263   : > { %871 = vrot.lane.b32.xlu1 %v847_v28, %s2250_s30  ;;  %860 = vrot.lane.b32.xlu0 %v852_v32, %s2248_s27 }
 0x267   : > { %882 = vrot.lane.b32.xlu1 %v2521_v33, %s2251_s16 }
 0x26b   : > { %854 = vrot.lane.b32.xlu1 %v852_v32, %s2249_s23 }
 0x2d1   : > { %v869_v34 = vpop.permute.xlu1 %868  ;;  %v875_v38 = vpop.permute.xlu0 %874 }
 0x2d2   : > { %v2524_v35 = vpack.c.bf16 %v869_v34, %v869_v34  ;;  %v2530_v40 = vpack.c.bf16 %v875_v38, %v875_v38 }
 0x2d4   : > { %932 = vrot.lane.b32.xlu1 %v2524_v35, %s2251_s16 }
 0x2d5   : > { %v872_v36 = vpop.permute.xlu1 %871  ;;  %v861_v51 = vpop.permute.xlu0 %860 }
 0x2d6   : > { %v2527_v37 = vpack.c.bf16 %v872_v36, %v872_v36  ;;  %v866_v54 = vpack.c.bf16 %v861_v51, %v861_v51 }
 0x2d8   : > { %981 = vrot.lane.b32.xlu1 %v2527_v37, %s2251_s16 }
 0x2d9   : > { %v883_v39 = vpop.permute.xlu1 %882 }
 0x2da   : > { %v889_v41 = vsel %vm884_vm5, %v883_v39, 0 }
 0x2db   : > { %1956 = vmatpush3.bf16.xpose.msra.mxu1 %v889_v41 }
 0x2dc   : > { %1030 = vrot.lane.b32.xlu1 %v2530_v40, %s2251_s16  ;;  %1967 = vmatprep.subr.bf16.mxu1 %v2246_v9 }
 0x2dd   : > { %v855_v43 = vpop.permute.xlu1 %854 }
 0x2de   : > { %v864_v48 = vpack.c.bf16 %v855_v43, %v855_v43 }
 0x2e0   : > { %857 = vrot.lane.b32.xlu1 %v852_v32, %s2250_s30 }
 0x2e2   : > { %1958 = vmatmul.mubr.msk.bf16.vlgmr.msra.gmra.mrb[0].mxu1 %vm884_vm5, %v863_v42 }
 0x2e3   : > { %1969 = vmatprep.mubr.msk.bf16.mxu1 %vm2247_vm2, %v2246_v9 }
 0x346   : > { %v933_v44 = vpop.permute.xlu1 %932 }
 0x347   : > { %v938_v45 = vsel %vm884_vm5, %v933_v44, 0 }
 0x348   : > { %1962 = vmatpush3.bf16.xpose.msra.mxu0 %v938_v45 }
 0x349   : > { %1973 = vmatprep.subr.bf16.mxu0 %v2246_v9 }
 0x34a   : > { %v982_v46 = vpop.permute.xlu1 %981 }
 0x34b   : > { %v987_v47 = vsel %vm884_vm5, %v982_v46, 0 }
 0x34c   : > { %1968 = vmatpush3.bf16.xpose.msra.mxu1 %v987_v47 }
 0x34d   : > { %1979 = vmatprep.subr.bf16.mxu1 %v2246_v9 }
 0x34e   : > { %v1031_v49 = vpop.permute.xlu1 %1030 }
 0x34f   : > { %v1036_v50 = vsel %vm884_vm5, %v1031_v49, 0  ;;  %1964 = vmatmul.mubr.msk.bf16.vlgmr.msra.gmra.mrb[4].mxu0 %vm884_vm5, %v864_v48 }
 0x350   : > { %1974 = vmatpush3.bf16.xpose.msra.mxu0 %v1036_v50  ;;  %1975 = vmatprep.mubr.msk.bf16.mxu0 %vm2247_vm2, %v2246_v9 }
 0x351   : > { %1985 = vmatprep.subr.bf16.mxu0 %v2246_v9 }
 0x352   : > { %v858_v52 = vpop.permute.xlu1 %857 }
 0x353   : > { %v865_v53 = vpack.c.bf16 %v858_v52, %v858_v52 }
 0x355   : > { %1970 = vmatmul.mubr.msk.bf16.vlgmr.msra.gmra.mrb[4].mxu1 %vm884_vm5, %v865_v53 }
 0x356   : > { %1981 = vmatprep.mubr.msk.bf16.mxu1 %vm2247_vm2, %v2246_v9 }
 0x357   : > { %1976 = vmatmul.mubr.msk.bf16.vlgmr.msra.gmra.mrb[8].mxu0 %vm884_vm5, %v866_v54 }
 0x358   : > { %1987 = vmatprep.mubr.msk.bf16.mxu0 %vm2247_vm2, %v2246_v9 }
 0x3b5   : > { %v925_v56 = vpop.f32.mrb[0].mxu1 }
 0x3b6   : > { %v1082_v57 = vsel %vm1079_vm6, -1e+09, %v925_v56  ;;  %v1959_v58 = vpop.f32.mrb[1].mxu1 }
 0x3b7   : > { %v928_v59 = vpop.f32.mrb[2].mxu1  ;;  %v1086_v60 = vsel %vm884_vm5, %v1082_v57, -inf }
 0x3b8   : > { %1087 = vmax.xlane.f32.xlu1 %v1086_v60  ;;  %v1960_v61 = vpop.f32.mrb[3].mxu1 }
 0x422   : > { %v974_v62 = vpop.f32.mrb[4].mxu0 }
 0x423   : > { %v1083_v63 = vsel %vm1079_vm6, -1e+09, %v974_v62  ;;  %v1965_v0 = vpop.f32.mrb[5].mxu0 }
 0x424   : > { %v977_v2 = vpop.f32.mrb[6].mxu0  ;;  %v1089_v3 = vsel %vm884_vm5, %v1083_v63, -inf }
 0x425   : > { %1090 = vmax.xlane.f32.xlu0 %v1089_v3  ;;  %v1966_v4 = vpop.f32.mrb[7].mxu0  ;;  %v2114_v3 = vld [vmem:[%s2449_s20] sm:$0xff]  }
 0x426   : > { %v2115_v4 = vld [vmem:[%s2449_s20 + $0x8] sm:$0xff]  }
 0x428   : > { %v1023_v5 = vpop.f32.mrb[4].mxu1 }
 0x429   : > { %v1084_v6 = vsel %vm1079_vm6, -1e+09, %v1023_v5  ;;  %v1971_v7 = vpop.f32.mrb[5].mxu1 }
 0x42a   : > { %v1026_v8 = vpop.f32.mrb[6].mxu1  ;;  %v1072_v10 = vpop.f32.mrb[8].mxu0  ;;  %v1092_v11 = vsel %vm884_vm5, %v1084_v6, -inf }
 0x42b   : > { %v1085_v12 = vsel %vm1079_vm6, -1e+09, %v1072_v10  ;;  %v1972_v13 = vpop.f32.mrb[7].mxu1  ;;  %1093 = vmax.xlane.f32.xlu0 %v1092_v11  ;;  %v1977_v14 = vpop.f32.mrb[9].mxu0 }
 0x42c   : > { %v1075_v15 = vpop.f32.mrb[10].mxu0  ;;  %v1095_v16 = vsel %vm884_vm5, %v1085_v12, -inf }
 0x42d   : > { %1096 = vmax.xlane.f32.xlu1 %v1095_v16  ;;  %v1978_v17 = vpop.f32.mrb[11].mxu0 }
 0x43e   : > { %1183 = vrot.lane.b32.xlu1 %v2524_v35, %s2252_s28 }
 0x441   : > { %1134 = vrot.lane.b32.xlu0 %v2521_v33, %s2252_s28 }
 0x445   : > { %v1088_v18 = vpop.xlane.xlu1 %1087 }
 0x446   : > { %v1098_v19 = vsub.f32 %v1082_v57, %v1088_v18 }
 0x448   : > { %v1102_v20 = vmul.f32 1.442695, %v1098_v19 }
 0x44a   : > { %2126 = vpow2.f32 %v1102_v20 }
 0x454   : > { %v2127_v21 = vpop.eup %2126 }
 0x455   : > { %v1110_v22 = vsel %vm884_vm5, %v2127_v21, 0.0 }
 0x460   : > { %1111 = vadd.xlane.f32.xlu0 %v1110_v22 }
 0x4b2   : > { %v1091_v23 = vpop.xlane.xlu0 %1090 }
 0x4b3   : > { %v1099_v24 = vsub.f32 %v1083_v63, %v1091_v23 }
 0x4b5   : > { %v1104_v25 = vmul.f32 1.442695, %v1099_v24 }
 0x4b7   : > { %2128 = vpow2.f32 %v1104_v25  ;;  %v1890_v25 = vld [vmem:[%s2777_s22] ss:$0 sm:$0xff] }
 0x4b8   : > { %v1094_v26 = vpop.xlane.xlu0 %1093 }
 0x4b9   : > { %v1100_v27 = vsub.f32 %v1084_v6, %v1094_v26 }
 0x4ba   : > { %v1097_v28 = vpop.xlane.xlu1 %1096 }
 0x4bb   : > { %v1106_v29 = vmul.f32 1.442695, %v1100_v27  ;;  %v1101_v30 = vsub.f32 %v1085_v12, %v1097_v28 }
 0x4bc   : > { %v1135_v31 = vpop.permute.xlu0 %1134 }
 0x4bd   : > { %2130 = vpow2.f32 %v1106_v29  ;;  %v1108_v32 = vmul.f32 1.442695, %v1101_v30  ;;  %v1141_v33 = vsel %vm1139_vm7, %v1135_v31, 0 }
 0x4be   : > { %1980 = vmatpush3.bf16.msra.mxu1 %v1141_v33  ;;  %v1184_v34 = vpop.permute.xlu1 %1183 }
 0x4bf   : > { %2132 = vpow2.f32 %v1108_v32  ;;  %v1189_v35 = vsel %vm1139_vm7, %v1184_v34, 0  ;;  %1991 = vmatprep.subr.bf16.mxu1 %v2246_v9 }
 0x4c0   : > { %1986 = vmatpush3.bf16.msra.mxu0 %v1189_v35 }
 0x4c1   : > { %v2129_v36 = vpop.eup %2128  ;;  %1997 = vmatprep.subr.bf16.mxu0 %v2246_v9 }
 0x4c2   : > { %v1113_v38 = vsel %vm884_vm5, %v2129_v36, 0.0 }
 0x4c3   : > { %1114 = vadd.xlane.f32.xlu1 %v1113_v38 }
 0x4c7   : > { %v2131_v39 = vpop.eup %2130 }
 0x4c8   : > { %v1116_v41 = vsel %vm884_vm5, %v2131_v39, 0.0 }
 0x4c9   : > { %v2133_v42 = vpop.eup %2132  ;;  %1117 = vadd.xlane.f32.xlu0 %v1116_v41  ;;  %v2117_v41 = vld [vmem:[%s2466_s1 + $0x8] sm:$0xff]  }
 0x4ca   : > { %v1119_v43 = vsel %vm884_vm5, %v2133_v42, 0.0 }
 0x4cb   : > { %1120 = vadd.xlane.f32.xlu1 %v1119_v43 }
 0x4dc   : > { %1231 = vrot.lane.b32.xlu1 %v2527_v37, %s2252_s28 }
 0x4df   : > { %1279 = vrot.lane.b32.xlu0 %v2530_v40, %s2252_s28 }
 0x4ed   : > { %v1112_v44 = vpop.xlane.xlu0 %1111 }
 0x4ee   : > { %2134 = vrcp.f32 %v1112_v44 }
 0x4f8   : > { %v2135_v45 = vpop.eup %2134 }
 0x4f9   : > { %v1126_v46 = vmul.f32 %v2135_v45, %v2127_v21 }
 0x4fb   : > { %v1130_v47 = vpack.c.bf16 %v1126_v46, %v1126_v46 }
 0x4fd   : > { %1982 = vmatmul.mubr.msk.bf16.vlgmr.msra.gmra.mrb[8].mxu1 %vm884_vm5, %v1130_v47 }
 0x4fe   : > { %1993 = vmatprep.mubr.msk.bf16.mxu1 %vm2247_vm2, %v2246_v9 }
 0x550   : > { %v1115_v48 = vpop.xlane.xlu1 %1114 }
 0x551   : > { %2136 = vrcp.f32 %v1115_v48 }
 0x556   : > { %v1118_v49 = vpop.xlane.xlu0 %1117 }
 0x557   : > { %2138 = vrcp.f32 %v1118_v49 }
 0x558   : > { %v1121_v50 = vpop.xlane.xlu1 %1120 }
 0x559   : > { %2140 = vrcp.f32 %v1121_v50 }
 0x55a   : > { %v1280_v40 = vpop.permute.xlu0 %1279 }
 0x55b   : > { %v2137_v37 = vpop.eup %2136  ;;  %v1285_v55 = vsel %vm1139_vm7, %v1280_v40, 0  ;;  %v1895_v40 = vld [vmem:[%s2779_s15] ss:$0 sm:$0xff] }
 0x55c   : > { %v1127_v51 = vmul.f32 %v2137_v37, %v2129_v36  ;;  %v1232_v52 = vpop.permute.xlu1 %1231  ;;  %v1894_v37 = vld [vmem:[%s2778_s26] ss:$0 sm:$0xff] }
 0x55d   : > { %v1237_v53 = vsel %vm1139_vm7, %v1232_v52, 0 }
 0x55e   : > { %1992 = vmatpush3.bf16.msra.mxu1 %v1237_v53  ;;  %v1131_v54 = vpack.c.bf16 %v1127_v51, %v1127_v51 }
 0x55f   : > { %2003 = vmatprep.subr.bf16.mxu1 %v2246_v9 }
 0x560   : > { %1988 = vmatmul.mubr.msk.bf16.vlgmr.msra.gmra.mrb[12].mxu0 %vm884_vm5, %v1131_v54 }
 0x561   : > { %v2139_v56 = vpop.eup %2138  ;;  %1998 = vmatpush3.bf16.msra.mxu0 %v1285_v55  ;;  %1999 = vmatprep.mubr.msk.bf16.mxu0 %vm2247_vm2, %v2246_v9 }
 0x562   : > { %v1128_v57 = vmul.f32 %v2139_v56, %v2131_v39  ;;  %2011 = vmatprep.subr.bf16.mxu0 %v2246_v9  ;;  %v2116_v39 = vld [vmem:[%s2466_s1] sm:$0xff]   ;;  %v2120_v56 = vld [vmem:[%s2476_s7 + $0x10] sm:$0xff]  }
 0x563   : > { %v2141_v58 = vpop.eup %2140 }
 0x564   : > { %v1129_v59 = vmul.f32 %v2141_v58, %v2133_v42  ;;  %v1132_v60 = vpack.c.bf16 %v1128_v57, %v1128_v57  ;;  %v2118_v42 = vld [vmem:[%s2476_s7] sm:$0xff]   ;;  %v2121_v57 = vld [vmem:[%s2476_s7 + $0x18] sm:$0xff]  }
 0x565   : > { %v1896_v58 = vld [vmem:[%s729_s4] ss:$0 sm:$0xff]  ;;  %s2781_s4 = sld [smem:[#allocation8_spill]] }
 0x566   : > { %1994 = vmatmul.mubr.msk.bf16.vlgmr.msra.gmra.mrb[12].mxu1 %vm884_vm5, %v1132_v60  ;;  %v1133_v61 = vpack.c.bf16 %v1129_v59, %v1129_v59 }
 0x567   : > { %2007 = vmatprep.mubr.msk.bf16.mxu1 %vm2247_vm2, %v2246_v9  ;;  %2004 = vmatpush3.bf16.msra.mxu1 %v2114_v3 }
 0x568   : > { %2000 = vmatmul.mubr.msk.bf16.vlgmr.msra.gmra.mrb[16].mxu0 %vm884_vm5, %v1133_v61  ;;  %2005 = vmatprep.subr.bf16.mxu1 %v2246_v9 }
 0x569   : > { %2015 = vmatprep.mubr.msk.bf16.mxu0 %vm2247_vm2, %v2246_v9  ;;  %2012 = vmatpush3.bf16.msra.mxu0 %v2116_v39 }
 0x56a   : > { %2013 = vmatprep.subr.bf16.mxu0 %v2246_v9 }
 0x56b   : > { %2006 = vmatpush3.bf16.msra.mxu1 %v2115_v4  ;;  %p1906_p1 = scmp.ne.s32.totalorder %s2781_s4, 1 }
 0x56c   : > { %2019 = vmatprep.subr.bf16.mxu1 %v2246_v9 }
 0x56d   : > { %2014 = vmatpush3.bf16.msra.mxu0 %v2117_v41 }
 0x5d0   : > { %v1177_v62 = vpop.f32.mrb[8].mxu1 }
 0x5d1   : > { %v1983_v63 = vpop.f32.mrb[9].mxu1 }
 0x5d2   : > { %v1180_v0 = vpop.f32.mrb[10].mxu1 }
 0x5d3   : > { %v1984_v2 = vpop.f32.mrb[11].mxu1 }
 0x633   : > { %v1225_v5 = vpop.f32.mrb[12].mxu0 }
 0x634   : > { %1328 = vrot.lane.b32.xlu1 %v1225_v5, %s2253_s18  ;;  %v1989_v6 = vpop.f32.mrb[13].mxu0 }
 0x635   : > { %v1228_v7 = vpop.f32.mrb[14].mxu0 }
 0x636   : > { %v1990_v8 = vpop.f32.mrb[15].mxu0 }
 0x639   : > { %v1273_v10 = vpop.f32.mrb[12].mxu1 }
 0x63a   : > { %1332 = vrot.lane.b32.xlu0 %v1273_v10, %s2254_s14  ;;  %v1995_v11 = vpop.f32.mrb[13].mxu1  ;;  %s2783_s14 = sld [smem:[#allocation26_spill]] (!%p1906_p1) }
 0x63b   : > { %v1276_v12 = vpop.f32.mrb[14].mxu1  ;;  %v1321_v13 = vpop.f32.mrb[16].mxu0 }
 0x63c   : > { %v1996_v14 = vpop.f32.mrb[15].mxu1  ;;  %1336 = vrot.lane.b32.xlu1 %v1321_v13, %s2255_s25  ;;  %v2001_v15 = vpop.f32.mrb[17].mxu0 }
 0x63d   : > { %v1324_v16 = vpop.f32.mrb[18].mxu0 }
 0x63e   : > { %v2002_v17 = vpop.f32.mrb[19].mxu0 }
 0x6a6   : > { %v1329_v18 = vpop.permute.xlu1 %1328 }
 0x6a7   : > { %v1339_v19 = vsel %vm884_vm5, %v1177_v62, %v1329_v18 }
 0x6ac   : > { %v1333_v20 = vpop.permute.xlu0 %1332 }
 0x6ad   : > { %v1341_v21 = vsel %vm1340_vm8, %v1339_v19, %v1333_v20 }
 0x6ae   : > { %v1337_v22 = vpop.permute.xlu1 %1336 }
 0x6af   : > { %v1343_v23 = vsel %vm1342_vm9, %v1341_v21, %v1337_v22 }
 0x6b0   : > { %v1344_v24 = vpack.c.bf16 %v1343_v23, %v1343_v23 }
 0x6b2   : > { %2008 = vmatmul.mubr.msk.bf16.vlgmr.msra.gmra.mrb[16].mxu1 %vm749_vm1, %v1344_v24 }
 0x6b3   : > { %2027 = vmatprep.mubr.msk.bf16.mxu1 %vm2247_vm2, %v2246_v9  ;;  %2020 = vmatpush3.bf16.msra.mxu1 %v2118_v42 }
 0x6b4   : > { %2021 = vmatprep.subr.bf16.mxu1 %v2246_v9 }
 0x785   : > { %v1405_v26 = vpop.f32.mrb[16].mxu1 }
 0x786   : > { %v1406_v27 = vadd.f32 %v1890_v25, %v1405_v26  ;;  %v2009_v28 = vpop.f32.mrb[17].mxu1 }
 0x787   : > { %v1408_v29 = vpop.f32.mrb[18].mxu1 }
 0x788   : > { %v1411_v30 = vadd.f32 %v1406_v27, %v2487_v1  ;;  %v2010_v31 = vpop.f32.mrb[19].mxu1  ;;  %v2119_v1 = vld [vmem:[%s2476_s7 + $0x8] sm:$0xff]   ;;  %v1908_v27 = vld [vmem:[%s2783_s14] ss:$0 sm:$0xff] (!%p1906_p1) }
 0x789   : > { %2022 = vmatpush3.bf16.msra.mxu1 %v2119_v1 }
 0x78a   : > { %v1414_v32 = vsel %vm749_vm1, %v1411_v30, 0.0  ;;  %2023 = vmatprep.subr.bf16.mxu1 %v2246_v9 }
 0x78b   : > { %1415 = vadd.xlane.f32.xlu0 %v1414_v32 }
 0x78d   : > { %2024 = vmatpush3.bf16.msra.mxu1 %v2120_v56 }
 0x78e   : > { %2025 = vmatprep.subr.bf16.mxu1 %v2246_v9  ;;  %v1900_v9 = vld [vmem:[%s737_s13] ss:$0 sm:$0xff]  ;;  %s2782_s13 = sld [smem:[#allocation25_spill]] (!%p1906_p1) }
 0x791   : > { %2026 = vmatpush3.bf16.msra.mxu1 %v2121_v57 }
 0x794   : > { %v1907_v24 = vld [vmem:[%s2782_s13] ss:$0 sm:$0xff] (!%p1906_p1) }
 0x818   : > { %v1416_v33 = vpop.xlane.xlu0 %1415 }
 0x819   : > { %v1417_v34 = vmul.f32 0.03125, %v1416_v33 }
 0x81b   : > { %v1418_v35 = vsub.f32 %v1411_v30, %v1417_v34 }
 0x81d   : > { %v1419_v36 = vmul.f32 %v1418_v35, %v1418_v35  ;;  %v1437_v51 = vmul.f32 %v1894_v37, %v1418_v35 }
 0x81f   : > { %v1420_v38 = vsel %vm749_vm1, %v1419_v36, 0.0 }
 0x820   : > { %1421 = vadd.xlane.f32.xlu1 %v1420_v38 }
 0x8ad   : > { %v1422_v43 = vpop.xlane.xlu1 %1421 }
 0x8ae   : > { %v1423_v44 = vmul.f32 0.032258064, %v1422_v43 }
 0x8b0   : > { %2142 = vrsqrt.f32 %v1423_v44  ;;  %vm1426_vm10 = vcmp.eq.f32.partialorder %v1423_v44, inf  ;;  %v1429_v47 = vand.u32 2147483648, %v1423_v44  ;;  %vm1428_vm11 = vcmp.eq.f32.partialorder %v1423_v44, 0.0 }
 0x8ba   : > { %v2143_v45 = vpop.eup %2142 }
 0x8bb   : > { %v1425_v46 = vmul.f32 %v2143_v45, %v1423_v44 }
 0x8bd   : > { %v1427_v48 = vsel %vm1426_vm10, %v1423_v44, %v1425_v46 }
 0x8be   : > { %v1430_v49 = vsel %vm1428_vm11, %v1429_v47, %v1427_v48 }
 0x8bf   : > { %v1438_v50 = vadd.f32 1e-06, %v1430_v49 }
 0x8c1   : > { %2144 = vrcp.f32 %v1438_v50 }
 0x8cb   : > { %v2145_v52 = vpop.eup %2144 }
 0x8cc   : > { %v1440_v53 = vmul.f32 %v2145_v52, %v1437_v51 }
 0x8ce   : > { %v1447_v54 = vadd.f32 %v1895_v40, %v1440_v53 }
 0x8d0   : > { %v1448_v55 = vpack.c.bf16 %v1447_v54, %v1447_v54 }
 0x8d2   : > { %2016 = vmatmul.mubr.msk.bf16.vlgmr.msra.gmra.mrb[20].mxu0 %vm749_vm1, %v1448_v55 }
 0x9a5   : > { %v1509_v59 = vpop.f32.mrb[20].mxu0 }
 0x9a6   : > { %v1510_v60 = vadd.f32 %v1896_v58, %v1509_v59  ;;  %v2017_v61 = vpop.f32.mrb[21].mxu0 }
 0x9a7   : > { %v1512_v62 = vpop.f32.mrb[22].mxu0 }
 0x9a8   : > { %v1515_v63 = vmax.f32 %v1510_v60, 0.0  ;;  %v2018_v0 = vpop.f32.mrb[23].mxu0 }
 0x9aa   : > { %v1516_v2 = vpack.c.bf16 %v1515_v63, %v1515_v63 }
 0x9ac   : > { %2028 = vmatmul.mubr.msk.bf16.vlgmr.msra.gmra.mrb[20].mxu1 %vm1556_vm12, %v1516_v2 }
 0xa7e   : > { %1605 = sbr.rel (%p1906_p1) target bundleno = 3019 (0xbcb), region = 92 }
 0xa7f   : > { %v1594_v3 = vpop.f32.mrb[20].mxu1 }
 0xa80   : > { %v1595_v4 = vadd.f32 %v1900_v9, %v1594_v3  ;;  %v2029_v5 = vpop.f32.mrb[21].mxu1 }
 0xa81   : > { %v1597_v6 = vpop.f32.mrb[22].mxu1 }
 0xa82   : > { %v1600_v7 = vadd.f32 %v1595_v4, %v1411_v30  ;;  %v2030_v8 = vpop.f32.mrb[23].mxu1 }
 0xa84   : > { %1601 = vst.msk [vmem:[%s2482_s21] sm:$0xff] %vm749_vm1, %v1600_v7  ;;  %v1608_v10 = vsel (!%p1906_p1), %vm749_vm1, %v1600_v7, 0.0 }
 0xa85   : > { %1609 = vadd.xlane.f32.xlu0 %v1608_v10 }
 0xb12   : > { %v1610_v11 = vpop.xlane.xlu0 %1609 }
 0xb13   : > { %v1611_v12 = vmul.f32 0.03125, %v1610_v11 }
 0xb15   : > { %v1612_v13 = vsub.f32 %v1600_v7, %v1611_v12 }
 0xb17   : > { %v1613_v14 = vmul.f32 %v1612_v13, %v1612_v13  ;;  %v1631_v25 = vmul.f32 %v1907_v24, %v1612_v13 }
 0xb19   : > { %v1614_v15 = vsel %vm749_vm1, %v1613_v14, 0.0 }
 0xb1a   : > { %1615 = vadd.xlane.f32.xlu0 %v1614_v15 }
 0xba7   : > { %v1616_v16 = vpop.xlane.xlu0 %1615 }
 0xba8   : > { %v1617_v17 = vmul.f32 0.032258064, %v1616_v16 }
 0xbaa   : > { %2146 = vrsqrt.f32 %v1617_v17  ;;  %vm1620_vm13 = vcmp.eq.f32.partialorder %v1617_v17, inf  ;;  %v1623_v20 = vand.u32 2147483648, %v1617_v17  ;;  %vm1622_vm14 = vcmp.eq.f32.partialorder %v1617_v17, 0.0 }
 0xbb4   : > { %v2147_v18 = vpop.eup %2146 }
 0xbb5   : > { %v1619_v19 = vmul.f32 %v2147_v18, %v1617_v17 }
 0xbb7   : > { %v1621_v21 = vsel %vm1620_vm13, %v1617_v17, %v1619_v19 }
 0xbb8   : > { %v1624_v22 = vsel %vm1622_vm14, %v1623_v20, %v1621_v21 }
 0xbb9   : > { %v1632_v23 = vadd.f32 1e-06, %v1624_v22 }
 0xbbb   : > { %2148 = vrcp.f32 %v1632_v23 }
 0xbc5   : > { %v2149_v26 = vpop.eup %2148 }
 0xbc6   : > { %v1634_v28 = vmul.f32 %v2149_v26, %v1631_v25 }
 0xbc8   : > { %v1641_v29 = vadd.f32 %v1908_v27, %v1634_v28 }
 0xbca   : > { %1642 = vst.msk [vmem:[%s2482_s21] sm:$0xff] %vm749_vm1, %v1641_v29 }
 0xbcb PF: > { %s2784_s25 = sld [smem:[#allocation9_spill]]  ;;  %s2785_s20 = sld [smem:[#allocation6_spill]] }
 0xbcc   : > { %s2787_s24 = sld [smem:[#allocation27_spill]]  ;;  %s1657_s17 = sshll.u32 %s2482_s21, 4  ;;  %s1658_s17 = int_to_ptr.vmem [resolvable:$true] %s1657_s17 }
 0xbcd   : > { %s2150_s27 = scalar_lea.vmem %s1658_s17, 128  ;;  %s2256_s23 = smov [#allocation2]  }
 0xbce   : > { %p2151_p2 = scmp.ne.s32.totalorder %s1658_s17, %s2150_s27  ;;  %s2154_s30 = sshll.u32 %s2256_s23, 4  ;;  %s2155_s30 = int_to_ptr.vmem [resolvable:$false] %s2154_s30 }
 0xbcf   : > { %s2156_s16 = scalar_lea.vmem %s2155_s30, 256  ;;  %p2157_p6 = scmp.lt.s32.totalorder %s1658_s17, %s2155_s30 }
 0xbd0   : > { %p2152_p4 = pnand %p2151_p2, %p2391_p3  ;;  %p2158_p7 = scmp.lt.s32.totalorder %s2156_s16, %s2150_s27 }
 0xbd1   : > { %s1910_s12 = sshll.u32 %s2784_s25, 7  ;;  %s2789_s15 = sand.u32 1, %s2785_s20  }
 0xbd2   : > { %s2788_s0 = smov %s2787_s24  ;;  %s2658_s26 = scalar_lea.hbm %s2787_s24, %s1910_s12 }
 0xbd3   : > { %s1644_s29 = scalar_lea.sflag [#allocation3], %s2789_s15  ;;  %p2153_p5 = pneg %p2152_p4 }
 0xbd4   : > { %p2159_p8 = por %p2158_p7, %p2157_p6 }
 0xbd6   : > { %p2160_p10 = pnand %p2159_p8, %p2153_p5 }
 0xbd8   : > { %2163 = shalt.err (!%p2160_p10)
}
 0xbd9   : > { %s2164_s21 = scalar_lea.hbm %s2658_s26, 128  ;;  %s2168_s19 = scalar_lea.hbm %s2788_s0, 256 }
 0xbda   : > { %p2165_p11 = scmp.ne.s32.totalorder %s2658_s26, %s2164_s21  ;;  %p2169_p0 = scmp.lt.u32.totalorder %s2658_s26, %s2788_s0 }
 0xbdb   : > { %p2170_p1 = scmp.lt.u32.totalorder %s2168_s19, %s2164_s21  ;;  %p2172_p4 = scmp.lt.u32.totalorder %s2164_s21, %s2658_s26 }
 0xbdc   : > { %p2166_p12 = pnand %p2165_p11, %p2391_p3 }
 0xbdd   : > { %p2171_p2 = por %p2170_p1, %p2169_p0 }
 0xbde   : > { %p2167_p13 = pneg %p2166_p12 }
 0xbdf   : > { %p2173_p5 = por %p2172_p4, %p2171_p2 }
 0xbe1   : > { %p2174_p6 = pnand %p2173_p5, %p2167_p13 }
 0xbe3   : > { %2177 = shalt.err (!%p2174_p6)
}
 0xbe4   : > { %2031 = dma.vmem_to_hbm [thread:$0]  (%p2391_p3), %s1658_s17, 128, %s2658_s26, %s1644_s29  }
 0xbe5 PF: > { %s2790_s18 = sld [smem:[#allocation12_spill]]  ;;  %s2791_s14 = sld [smem:[#allocation5_spill]] }
 0xbeb   : > { %p2037_p7 = scmp.ge.s32.totalorder %s2790_s18, 2  ;;  %s1669_s20 = sand.u32 1, %s2791_s14  }
 0xbec   : > { %s1670_s12 = scalar_lea.sflag [#allocation3], %s1669_s20 }
 0xbed   : > { %p2034_p8 = pnand %p2037_p7, %p2401_p9 }
 0xbef   : > { %2211 = dma.done.wait (!%p2034_p8), %s1670_s12, 128  }
 0xbf0   : > { %2213 = vsyncadd (!%p2034_p8), %s1670_s12, 4294967168  ;;  %s29_s28 = sadd.s32 1, %s2790_s18   ;;  %s2793_s21 = sld [smem:[#allocation6_spill]] }
 0xbf1   : > { %p26_p10 = scmp.ge.s32.totalorder %s29_s28, 6   ;;  %s2794_s22 = sld [smem:[#allocation7_spill]] }
 0xbf2   : > { %s2795_s23 = sld [smem:[#allocation17_spill]]  ;;  %s2796_s24 = sld [smem:[#allocation10_spill]] }
 0xbf3   : > { %s2797_s25 = sld [smem:[#allocation11_spill]]  ;;  %s2798_s26 = sld [smem:[#allocation13_spill]] }
 0xbf4   : > { %s2799_s27 = sld [smem:[#allocation15_spill]]  ;;  %28 = sbr.rel (!%p26_p10) target bundleno = 16 (0x10), region = 166 }
 0xbfb   :  { %1675 = vsyncpa [#allocation3], 1 }
 0xbfc   :  { %1677 = vsyncpa [#allocation3 + $0x1], 1 }

</bundles_post_ra>
